<compile_context>
chip_gen: v7x
topology: tpu7x:2x2x1
jax: 0.10.0
libtpu: 0.0.40
codegen_flags: <defaults>
</compile_context>

<pallas_src>
import functools
import numpy as np

import jax
import jax.numpy as jnp
from jax.experimental import pallas as pl
from jax.experimental.pallas import tpu as pltpu


# ----------------------------------------------------------------------------
# small helpers
# ----------------------------------------------------------------------------

def bn_affine(bn, eps=1e-5):
    """Eval-mode BatchNorm1d as per-channel (scale, shift)."""
    s = bn['gamma'] / jnp.sqrt(bn['rvar'] + eps)
    t = bn['beta'] - bn['rmean'] * s
    return s, t


def _ln(x, a, b, eps):
    """Reference custom LayerNorm: Bessel-corrected std, eps added to std (not var).
    x: (T, C); a/b: (1, C)."""
    mean = jnp.mean(x, axis=-1, keepdims=True)
    d = x - mean
    var = jnp.sum(d * d, axis=-1, keepdims=True) / (x.shape[-1] - 1)
    return a * d / (jnp.sqrt(var) + eps) + b


# ----------------------------------------------------------------------------
# Kernel 1: fused FCBlock  (fc1 -> BN -> LReLU -> [Linear residual block] -> fc2)
# ----------------------------------------------------------------------------

def _fcblock_kernel(x_ref, w1_ref, s1_ref, t1_ref,
                    bw1_ref, bs1_ref, bt1_ref,
                    bw2_ref, bs2_ref, bt2_ref,
                    w2_ref, b2_ref, o_ref):
    def lrelu(z):
        return jnp.where(z >= 0, z, 0.2 * z)

    x = x_ref[...]
    h = lrelu(jnp.dot(x, w1_ref[...], preferred_element_type=jnp.float32)
              * s1_ref[...] + t1_ref[...])
    y = lrelu(jnp.dot(h, bw1_ref[...], preferred_element_type=jnp.float32)
              * bs1_ref[...] + bt1_ref[...])
    y = lrelu(jnp.dot(y, bw2_ref[...], preferred_element_type=jnp.float32)
              * bs2_ref[...] + bt2_ref[...])
    h = h + y
    o_ref[...] = jnp.dot(h, w2_ref[...], preferred_element_type=jnp.float32) + b2_ref[...]


def fcblock_forward(x_tok, p):
    """FCBlock(channel_in, channel_out, linear_size, block_num=1), eval mode, one kernel.
    x_tok: (M, Cin) token-major."""
    M, Cin = x_tok.shape
    L = p['fc1_w'].shape[1]
    C = p['fc2_w'].shape[1]

    s1, t1 = bn_affine(p['bn1'])
    t1 = p['fc1_b'] * s1 + t1                      # fold conv bias through BN affine
    bs1, bt1 = bn_affine(p['blk_bn1'])
    bt1 = p['blk_b1'] * bs1 + bt1
    bs2, bt2 = bn_affine(p['blk_bn2'])
    bt2 = p['blk_b2'] * bs2 + bt2

    def full(shape):
        return pl.BlockSpec(shape, lambda i: (0,) * len(shape))

    return pl.pallas_call(
        _fcblock_kernel,
        out_shape=jax.ShapeDtypeStruct((M, C), jnp.float32),
        grid=(1,),
        in_specs=[
            full((M, Cin)),
            full((Cin, L)), full((1, L)), full((1, L)),
            full((L, L)), full((1, L)), full((1, L)),
            full((L, L)), full((1, L)), full((1, L)),
            full((L, C)), full((1, C)),
        ],
        out_specs=full((M, C)),
        compiler_params=pltpu.CompilerParams(
            dimension_semantics=("parallel",),
            vmem_limit_bytes=32 * 1024 * 1024),
    )(x_tok.astype(jnp.float32),
      p['fc1_w'].astype(jnp.float32), s1.reshape(1, L), t1.reshape(1, L),
      p['blk_w1'].astype(jnp.float32), bs1.reshape(1, L), bt1.reshape(1, L),
      p['blk_w2'].astype(jnp.float32), bs2.reshape(1, L), bt2.reshape(1, L),
      p['fc2_w'].astype(jnp.float32), p['fc2_b'].reshape(1, C).astype(jnp.float32))


# ----------------------------------------------------------------------------
# Kernel 2: fused transformer stack (all layers in one pallas_call) + epilogue
# ----------------------------------------------------------------------------

def _transformer_stack_kernel(
        x_ref,                                     # (1, T, C)     input tokens for this batch
        wqkv_ref, bqkv_ref, wo_ref, bo_ref,        # per-layer (selected by layer grid axis)
        ln1a_ref, ln1b_ref, ffw1_ref, ffb1_ref,
        ffw2_ref, ffb2_ref, ln2a_ref, ln2b_ref,
        epi_lna_ref, epi_lnb_ref, epi_w_ref, epi_b_ref,   # epilogue params (resident)
        out_ref,                                   # (1, T, C_out)
        h_ref,                                     # VMEM scratch (T, C): layer carry
        *, heads, ln_eps, use_epi_ln):
    layer = pl.program_id(1)

    @pl.when(layer == 0)
    def _():
        h_ref[...] = x_ref[0]

    T, C = h_ref.shape
    dk = C // heads
    sm_scale = 1.0 / float(np.sqrt(dk))

    x = h_ref[...]                                                 # (T, C)

    # ---- fused QKV projection: one (T, C) x (C, 3C) matmul ----
    qkv = jnp.dot(x, wqkv_ref[0], preferred_element_type=jnp.float32) + bqkv_ref[0]

    # ---- multi-head attention; head split/merge via static lane slices ----
    wo = wo_ref[0]                                                 # (C, C)
    attn = jnp.zeros((T, C), jnp.float32)
    for h in range(heads):
        lo, hi = h * dk, (h + 1) * dk
        qh = qkv[:, lo:hi]
        kh = qkv[:, C + lo:C + hi]
        vh = qkv[:, 2 * C + lo:2 * C + hi]
        s = jnp.einsum('td,sd->ts', qh, kh,
                       preferred_element_type=jnp.float32) * sm_scale
        s = s - jnp.max(s, axis=-1, keepdims=True)
        p = jnp.exp(s)
        denom = jnp.sum(p, axis=-1, keepdims=True)
        oh = jnp.dot(p, vh, preferred_element_type=jnp.float32)
        oh = oh * pl.reciprocal(denom, approx=True)                # EUP slot, not VALU divide
        # merge heads by accumulating o_h @ Wo[h] instead of concatenating lanes
        attn = attn + jnp.dot(oh, wo[lo:hi, :], preferred_element_type=jnp.float32)
    attn = attn + bo_ref[0]

    # ---- residual + LN1 (custom LayerNorm) ----
    h1 = _ln(x + attn, ln1a_ref[0], ln1b_ref[0], ln_eps)

    # ---- FFN (two matmuls + ReLU, intermediate never leaves VMEM) + residual + LN2 ----
    f = jnp.dot(h1, ffw1_ref[0], preferred_element_type=jnp.float32) + ffb1_ref[0]
    f = jnp.maximum(f, 0.0)
    f = jnp.dot(f, ffw2_ref[0], preferred_element_type=jnp.float32) + ffb2_ref[0]
    h2 = _ln(h1 + f, ln2a_ref[0], ln2b_ref[0], ln_eps)

    h_ref[...] = h2                                                # carry to next layer

    # ---- epilogue on the last layer: (optional LN) + output projection ----
    @pl.when(layer == pl.num_programs(1) - 1)
    def _():
        y = h2
        if use_epi_ln:
            y = _ln(y, epi_lna_ref[...], epi_lnb_ref[...], ln_eps)
        out_ref[0] = (jnp.dot(y, epi_w_ref[...], preferred_element_type=jnp.float32)
                      + epi_b_ref[...])


def stack_layer_params(layers):
    """Stack per-layer transformer params along a leading layer axis (QKV fused)."""
    def stack(fn):
        return jnp.stack([fn(lp).astype(jnp.float32) for lp in layers], axis=0)
    return {
        'wqkv': stack(lambda lp: jnp.concatenate([lp['wq'], lp['wk'], lp['wv']], axis=1)),
        'bqkv': stack(lambda lp: jnp.concatenate([lp['bq'], lp['bk'], lp['bv']]).reshape(1, -1)),
        'wo': stack(lambda lp: lp['wo']),
        'bo': stack(lambda lp: lp['bo'].reshape(1, -1)),
        'ln1a': stack(lambda lp: lp['ln1_a'].reshape(1, -1)),
        'ln1b': stack(lambda lp: lp['ln1_b'].reshape(1, -1)),
        'ffw1': stack(lambda lp: lp['ff_w1']),
        'ffb1': stack(lambda lp: lp['ff_b1'].reshape(1, -1)),
        'ffw2': stack(lambda lp: lp['ff_w2']),
        'ffb2': stack(lambda lp: lp['ff_b2'].reshape(1, -1)),
        'ln2a': stack(lambda lp: lp['ln2_a'].reshape(1, -1)),
        'ln2b': stack(lambda lp: lp['ln2_b'].reshape(1, -1)),
    }


def transformer_stack(x3, st, epi_lna, epi_lnb, epi_w, epi_b, *,
                      heads, use_epi_ln, ln_eps=1e-6):
    """Run a full post-LN transformer stack + epilogue projection in ONE pallas_call.
    x3: (B, T, C)  ->  (B, T, C_out)."""
    B, T, C = x3.shape
    NL = st['wqkv'].shape[0]
    C_out = epi_w.shape[1]

    kernel = functools.partial(_transformer_stack_kernel, heads=heads,
                               ln_eps=ln_eps, use_epi_ln=use_epi_ln)

    def per_layer(arr):                 # weight selected by the layer grid index
        shp = arr.shape
        return pl.BlockSpec((1,) + shp[1:], lambda b, l: (l,) + (0,) * (len(shp) - 1))

    def resident(arr):                  # constant block -> stays VMEM resident
        shp = arr.shape
        return pl.BlockSpec(shp, lambda b, l: (0,) * len(shp))

    in_specs = [
        pl.BlockSpec((1, T, C), lambda b, l: (b, 0, 0)),
        per_layer(st['wqkv']), per_layer(st['bqkv']),
        per_layer(st['wo']), per_layer(st['bo']),
        per_layer(st['ln1a']), per_layer(st['ln1b']),
        per_layer(st['ffw1']), per_layer(st['ffb1']),
        per_layer(st['ffw2']), per_layer(st['ffb2']),
        per_layer(st['ln2a']), per_layer(st['ln2b']),
        resident(epi_lna), resident(epi_lnb),
        resident(epi_w), resident(epi_b),
    ]

    return pl.pallas_call(
        kernel,
        out_shape=jax.ShapeDtypeStruct((B, T, C_out), jnp.float32),
        grid=(B, NL),
        in_specs=in_specs,
        out_specs=pl.BlockSpec((1, T, C_out), lambda b, l: (b, 0, 0)),
        scratch_shapes=[pltpu.VMEM((T, C), jnp.float32)],
        compiler_params=pltpu.CompilerParams(
            dimension_semantics=("parallel", "arbitrary"),
            vmem_limit_bytes=32 * 1024 * 1024),
    )(x3.astype(jnp.float32),
      st['wqkv'], st['bqkv'], st['wo'], st['bo'],
      st['ln1a'], st['ln1b'], st['ffw1'], st['ffb1'],
      st['ffw2'], st['ffb2'], st['ln2a'], st['ln2b'],
      epi_lna.astype(jnp.float32), epi_lnb.astype(jnp.float32),
      epi_w.astype(jnp.float32), epi_b.astype(jnp.float32))


# ----------------------------------------------------------------------------
# Model_MAE forward
# ----------------------------------------------------------------------------

def model_mae_forward(params, cfg, x_in, mask, spatial_mask):
    """x_in: (B, 2, F, J, 1); mask: bool (F,); spatial_mask: bool (F, J)."""
    B = x_in.shape[0]
    F = cfg['frames']
    J_in, J_out = cfg['n_joints'], cfg['out_joints']
    C, C_dec = cfg['channel'], cfg['channel'] // 2

    # ----- input masking (glue) -----
    x = jnp.asarray(x_in, jnp.float32)[..., 0].transpose(0, 2, 3, 1)       # (B, F, J, 2)
    sm = jnp.asarray(spatial_mask, bool)
    x = jnp.where(sm[None, :, :, None], params['spatial_mask_token'].reshape(1, 1, 1, 2), x)
    x = x.reshape(B, F, 2 * J_in)                                          # (B, F, 2J)

    # ----- FCBlock encoder: one fused kernel over all B*F tokens -----
    h = fcblock_forward(x.reshape(B * F, 2 * J_in), params['encoder'])
    x = h.reshape(B, F, C)

    # ----- MAE encoder: pos embed, drop masked frames -----
    mask_np = np.asarray(mask, bool)
    vis_idx = np.where(~mask_np)[0]
    msk_idx = np.where(mask_np)[0]

    x = x + params['enc_pos_embedding']                                    # (B, F, C)
    x = x[:, vis_idx]                                                      # (B, Nvis, C)

    # one kernel: all encoder layers + encoder_LN + encoder_to_decoder (no bias)
    enc_stack = stack_layer_params(params['transformer'])
    feas = transformer_stack(
        x, enc_stack,
        epi_lna=params['encoder_LN']['a'].reshape(1, C),
        epi_lnb=params['encoder_LN']['b'].reshape(1, C),
        epi_w=params['enc2dec_w'],
        epi_b=jnp.zeros((1, C_dec), jnp.float32),
        heads=cfg['heads_enc'], use_epi_ln=True)                           # (B, Nvis, C_dec)

    # ----- assemble decoder input (glue) -----
    pos = jnp.broadcast_to(params['dec_pos_embedding'], (B, F, C_dec))
    pos_vis = pos[:, vis_idx]
    pos_msk = pos[:, msk_idx]
    x_full = jnp.concatenate([feas + pos_vis, params['mask_token'] + pos_msk], axis=1)  # (B,F,Cd)

    # one kernel: all decoder layers + fcn_dec (BN folded into the 1x1 conv)
    dec_stack = stack_layer_params(params['transformer_dec'])
    s, t = bn_affine(params['fcn_dec']['bn'])
    w_head = params['fcn_dec']['conv_w'] * s[:, None]
    b_head = (params['fcn_dec']['conv_b'] + t @ params['fcn_dec']['conv_w']).reshape(1, -1)

    out = transformer_stack(
        x_full, dec_stack,
        epi_lna=jnp.ones((1, C_dec), jnp.float32),      # unused (use_epi_ln=False)
        epi_lnb=jnp.zeros((1, C_dec), jnp.float32),
        epi_w=w_head, epi_b=b_head,
        heads=cfg['heads_dec'], use_epi_ln=False)                          # (B, F, 2*J_out)

    # ----- reshape to torch output layout: view(b, J_out, 2, F) -> (B, 2, F, J_out, 1) -----
    out = out.reshape(B, F, 2 * J_out).transpose(0, 2, 1)                  # (B, 2*J_out, F)
    out = out.reshape(B, J_out, 2, F).transpose(0, 2, 3, 1)                # (B, 2, F, J_out)
    return out[..., None]                                                  # (B, 2, F, J_out, 1)


# ----------------------------------------------------------------------------
# Deterministic parameter initialization
# ----------------------------------------------------------------------------

def init_params(key, cfg):
    keys = iter(jax.random.split(key, 256))

    def nrm(shape, s=0.05):
        return s * jax.random.normal(next(keys), shape, jnp.float32)

    def bn(c):
        return {'gamma': jnp.ones((c,), jnp.float32) + nrm((c,), 0.01),
                'beta': nrm((c,), 0.01),
                'rmean': jnp.zeros((c,), jnp.float32),
                'rvar': jnp.ones((c,), jnp.float32)}

    def layer(c, d_ff):
        return {'wq': nrm((c, c)), 'bq': nrm((c,)),
                'wk': nrm((c, c)), 'bk': nrm((c,)),
                'wv': nrm((c, c)), 'bv': nrm((c,)),
                'wo': nrm((c, c)), 'bo': nrm((c,)),
                'ln1_a': jnp.ones((c,), jnp.float32), 'ln1_b': jnp.zeros((c,), jnp.float32),
                'ff_w1': nrm((c, d_ff)), 'ff_b1': nrm((d_ff,)),
                'ff_w2': nrm((d_ff, c)), 'ff_b2': nrm((c,)),
                'ln2_a': jnp.ones((c,), jnp.float32), 'ln2_b': jnp.zeros((c,), jnp.float32)}

    C, d_hid, F = cfg['channel'], cfg['d_hid'], cfg['frames']
    C_dec, d_hid_dec = C // 2, d_hid // 2
    Cin, Cout = 2 * cfg['n_joints'], 2 * cfg['out_joints']
    L = 2 * C  # FCBlock linear_size

    params = {
        'spatial_mask_token': nrm((1, 1, 2), 1.0),
        'mask_token': nrm((1, 1, C_dec), 1.0),
        'dec_pos_embedding': nrm((1, F, C_dec), 1.0),
        'enc_pos_embedding': nrm((1, F, C), 1.0),
        'encoder': {
            'fc1_w': nrm((Cin, L)), 'fc1_b': nrm((L,)), 'bn1': bn(L),
            'blk_w1': nrm((L, L)), 'blk_b1': nrm((L,)), 'blk_bn1': bn(L),
            'blk_w2': nrm((L, L)), 'blk_b2': nrm((L,)), 'blk_bn2': bn(L),
            'fc2_w': nrm((L, C)), 'fc2_b': nrm((C,)),
        },
        'transformer': [layer(C, d_hid) for _ in range(cfg['layers'])],
        'encoder_LN': {'a': jnp.ones((C,), jnp.float32), 'b': jnp.zeros((C,), jnp.float32)},
        'enc2dec_w': nrm((C, C_dec)),
        'transformer_dec': [layer(C_dec, d_hid_dec) for _ in range(cfg['layers'] - 1)],
        'fcn_dec': {'bn': bn(C_dec), 'conv_w': nrm((C_dec, Cout)), 'conv_b': nrm((Cout,))},
    }
    return params


# ----------------------------------------------------------------------------
# Main
# ----------------------------------------------------------------------------

if __name__ == "__main__":
    cfg = dict(layers=2, channel=32, d_hid=64, frames=8,
               n_joints=4, out_joints=4, spatial_mask_num=2,
               heads_enc=4, heads_dec=2)

    key = jax.random.PRNGKey(0)
    k_param, k_x = jax.random.split(key)
    params = init_params(k_param, cfg)

    B, F, J = 2, cfg['frames'], cfg['n_joints']
    x_in = jax.random.normal(k_x, (B, 2, F, J, 1), jnp.float32)

    # temporal MAE mask: 3 of 8 frames masked
    mask = np.zeros((F,), bool)
    mask[[1, 4, 6]] = True
    # spatial mask: spatial_mask_num joints masked in every frame
    spatial_mask = np.zeros((F, J), bool)
    spatial_mask[:, :cfg['spatial_mask_num']] = True

    out = model_mae_forward(params, cfg, x_in, mask, spatial_mask)
    out = jax.block_until_ready(out)

    assert out.shape == (B, 2, F, cfg['out_joints'], 1), out.shape
    assert jnp.all(jnp.isfinite(out))
    print("KERNEL_OK")
</pallas_src>

<mosaic_0001>
module attributes {stable_mosaic.version = 11 : i64} {
  func.func @_fcblock_kernel(%arg0: i32, %arg1: memref<16x8xf32, #tpu.memory_space<vmem>>, %arg2: memref<8x64xf32, #tpu.memory_space<vmem>>, %arg3: memref<1x64xf32, #tpu.memory_space<vmem>>, %arg4: memref<1x64xf32, #tpu.memory_space<vmem>>, %arg5: memref<64x64xf32, #tpu.memory_space<vmem>>, %arg6: memref<1x64xf32, #tpu.memory_space<vmem>>, %arg7: memref<1x64xf32, #tpu.memory_space<vmem>>, %arg8: memref<64x64xf32, #tpu.memory_space<vmem>>, %arg9: memref<1x64xf32, #tpu.memory_space<vmem>>, %arg10: memref<1x64xf32, #tpu.memory_space<vmem>>, %arg11: memref<64x32xf32, #tpu.memory_space<vmem>>, %arg12: memref<1x32xf32, #tpu.memory_space<vmem>>, %arg13: memref<16x32xf32, #tpu.memory_space<vmem>>) attributes {dimension_semantics = [#tpu.dimension_semantics<parallel>], iteration_bounds = array<i64: 1>, scalar_prefetch = 0 : i64, scratch_operands = 0 : i64, tpu.core_type = #tpu.core_type<tc>, window_params = [{pipeline_mode = #tpu.pipeline_mode<synchronous>, transform_indices = @transform_0, window_bounds = array<i64: 16, 8>}, {pipeline_mode = #tpu.pipeline_mode<synchronous>, transform_indices = @transform_1, window_bounds = array<i64: 8, 64>}, {pipeline_mode = #tpu.pipeline_mode<synchronous>, transform_indices = @transform_2, window_bounds = array<i64: 1, 64>}, {pipeline_mode = #tpu.pipeline_mode<synchronous>, transform_indices = @transform_3, window_bounds = array<i64: 1, 64>}, {pipeline_mode = #tpu.pipeline_mode<synchronous>, transform_indices = @transform_4, window_bounds = array<i64: 64, 64>}, {pipeline_mode = #tpu.pipeline_mode<synchronous>, transform_indices = @transform_5, window_bounds = array<i64: 1, 64>}, {pipeline_mode = #tpu.pipeline_mode<synchronous>, transform_indices = @transform_6, window_bounds = array<i64: 1, 64>}, {pipeline_mode = #tpu.pipeline_mode<synchronous>, transform_indices = @transform_7, window_bounds = array<i64: 64, 64>}, {pipeline_mode = #tpu.pipeline_mode<synchronous>, transform_indices = @transform_8, window_bounds = array<i64: 1, 64>}, {pipeline_mode = #tpu.pipeline_mode<synchronous>, transform_indices = @transform_9, window_bounds = array<i64: 1, 64>}, {pipeline_mode = #tpu.pipeline_mode<synchronous>, transform_indices = @transform_10, window_bounds = array<i64: 64, 32>}, {pipeline_mode = #tpu.pipeline_mode<synchronous>, transform_indices = @transform_11, window_bounds = array<i64: 1, 32>}, {pipeline_mode = #tpu.pipeline_mode<synchronous>, transform_indices = @transform_12, window_bounds = array<i64: 16, 32>}]} {
    %c0 = arith.constant 0 : index
    %c0_0 = arith.constant 0 : index
    %0 = vector.load %arg1[%c0, %c0_0] : memref<16x8xf32, #tpu.memory_space<vmem>>, vector<16x8xf32>
    %c0_1 = arith.constant 0 : index
    %c0_2 = arith.constant 0 : index
    %1 = vector.load %arg2[%c0_1, %c0_2] : memref<8x64xf32, #tpu.memory_space<vmem>>, vector<8x64xf32>
    %cst = arith.constant dense<0.000000e+00> : vector<16x64xf32>
    %2 = tpu.matmul %0, %1, %cst {dimension_numbers = #tpu.dot_dimension_numbers<[1], [0], [0], [1], [0, 0, 1, 1], [], []>} : vector<16x8xf32>, vector<8x64xf32>, vector<16x64xf32> -> vector<16x64xf32>
    %c0_3 = arith.constant 0 : index
    %c0_4 = arith.constant 0 : index
    %3 = vector.load %arg3[%c0_3, %c0_4] : memref<1x64xf32, #tpu.memory_space<vmem>>, vector<1x64xf32>
    %4 = vector.broadcast %3 : vector<1x64xf32> to vector<16x64xf32>
    %5 = arith.mulf %2, %4 : vector<16x64xf32>
    %c0_5 = arith.constant 0 : index
    %c0_6 = arith.constant 0 : index
    %6 = vector.load %arg4[%c0_5, %c0_6] : memref<1x64xf32, #tpu.memory_space<vmem>>, vector<1x64xf32>
    %7 = vector.broadcast %6 : vector<1x64xf32> to vector<16x64xf32>
    %8 = arith.addf %5, %7 : vector<16x64xf32>
    %cst_7 = arith.constant 0.000000e+00 : f32
    %9 = vector.broadcast %cst_7 : f32 to vector<16x64xf32>
    %10 = arith.cmpf oge, %8, %9 : vector<16x64xf32>
    %cst_8 = arith.constant 2.000000e-01 : f32
    %11 = vector.broadcast %cst_8 : f32 to vector<16x64xf32>
    %12 = arith.mulf %11, %8 : vector<16x64xf32>
    %13 = arith.select %10, %8, %12 : vector<16x64xi1>, vector<16x64xf32>
    %c0_9 = arith.constant 0 : index
    %c0_10 = arith.constant 0 : index
    %14 = vector.load %arg5[%c0_9, %c0_10] : memref<64x64xf32, #tpu.memory_space<vmem>>, vector<64x64xf32>
    %cst_11 = arith.constant dense<0.000000e+00> : vector<16x64xf32>
    %15 = tpu.matmul %13, %14, %cst_11 {dimension_numbers = #tpu.dot_dimension_numbers<[1], [0], [0], [1], [0, 0, 1, 1], [], []>} : vector<16x64xf32>, vector<64x64xf32>, vector<16x64xf32> -> vector<16x64xf32>
    %c0_12 = arith.constant 0 : index
    %c0_13 = arith.constant 0 : index
    %16 = vector.load %arg6[%c0_12, %c0_13] : memref<1x64xf32, #tpu.memory_space<vmem>>, vector<1x64xf32>
    %17 = vector.broadcast %16 : vector<1x64xf32> to vector<16x64xf32>
    %18 = arith.mulf %15, %17 : vector<16x64xf32>
    %c0_14 = arith.constant 0 : index
    %c0_15 = arith.constant 0 : index
    %19 = vector.load %arg7[%c0_14, %c0_15] : memref<1x64xf32, #tpu.memory_space<vmem>>, vector<1x64xf32>
    %20 = vector.broadcast %19 : vector<1x64xf32> to vector<16x64xf32>
    %21 = arith.addf %18, %20 : vector<16x64xf32>
    %cst_16 = arith.constant 0.000000e+00 : f32
    %22 = vector.broadcast %cst_16 : f32 to vector<16x64xf32>
    %23 = arith.cmpf oge, %21, %22 : vector<16x64xf32>
    %cst_17 = arith.constant 2.000000e-01 : f32
    %24 = vector.broadcast %cst_17 : f32 to vector<16x64xf32>
    %25 = arith.mulf %24, %21 : vector<16x64xf32>
    %26 = arith.select %23, %21, %25 : vector<16x64xi1>, vector<16x64xf32>
    %c0_18 = arith.constant 0 : index
    %c0_19 = arith.constant 0 : index
    %27 = vector.load %arg8[%c0_18, %c0_19] : memref<64x64xf32, #tpu.memory_space<vmem>>, vector<64x64xf32>
    %cst_20 = arith.constant dense<0.000000e+00> : vector<16x64xf32>
    %28 = tpu.matmul %26, %27, %cst_20 {dimension_numbers = #tpu.dot_dimension_numbers<[1], [0], [0], [1], [0, 0, 1, 1], [], []>} : vector<16x64xf32>, vector<64x64xf32>, vector<16x64xf32> -> vector<16x64xf32>
    %c0_21 = arith.constant 0 : index
    %c0_22 = arith.constant 0 : index
    %29 = vector.load %arg9[%c0_21, %c0_22] : memref<1x64xf32, #tpu.memory_space<vmem>>, vector<1x64xf32>
    %30 = vector.broadcast %29 : vector<1x64xf32> to vector<16x64xf32>
    %31 = arith.mulf %28, %30 : vector<16x64xf32>
    %c0_23 = arith.constant 0 : index
    %c0_24 = arith.constant 0 : index
    %32 = vector.load %arg10[%c0_23, %c0_24] : memref<1x64xf32, #tpu.memory_space<vmem>>, vector<1x64xf32>
    %33 = vector.broadcast %32 : vector<1x64xf32> to vector<16x64xf32>
    %34 = arith.addf %31, %33 : vector<16x64xf32>
    %cst_25 = arith.constant 0.000000e+00 : f32
    %35 = vector.broadcast %cst_25 : f32 to vector<16x64xf32>
    %36 = arith.cmpf oge, %34, %35 : vector<16x64xf32>
    %cst_26 = arith.constant 2.000000e-01 : f32
    %37 = vector.broadcast %cst_26 : f32 to vector<16x64xf32>
    %38 = arith.mulf %37, %34 : vector<16x64xf32>
    %39 = arith.select %36, %34, %38 : vector<16x64xi1>, vector<16x64xf32>
    %40 = arith.addf %13, %39 : vector<16x64xf32>
    %c0_27 = arith.constant 0 : index
    %c0_28 = arith.constant 0 : index
    %41 = vector.load %arg11[%c0_27, %c0_28] : memref<64x32xf32, #tpu.memory_space<vmem>>, vector<64x32xf32>
    %cst_29 = arith.constant dense<0.000000e+00> : vector<16x32xf32>
    %42 = tpu.matmul %40, %41, %cst_29 {dimension_numbers = #tpu.dot_dimension_numbers<[1], [0], [0], [1], [0, 0, 1, 1], [], []>} : vector<16x64xf32>, vector<64x32xf32>, vector<16x32xf32> -> vector<16x32xf32>
    %c0_30 = arith.constant 0 : index
    %c0_31 = arith.constant 0 : index
    %43 = vector.load %arg12[%c0_30, %c0_31] : memref<1x32xf32, #tpu.memory_space<vmem>>, vector<1x32xf32>
    %44 = vector.broadcast %43 : vector<1x32xf32> to vector<16x32xf32>
    %45 = arith.addf %42, %44 : vector<16x32xf32>
    %c0_32 = arith.constant 0 : index
    %c0_33 = arith.constant 0 : index
    %46 = vector.load %arg13[%c0_32, %c0_33] : memref<16x32xf32, #tpu.memory_space<vmem>>, vector<16x32xf32>
    tpu.vector_store %arg13[%c0_32, %c0_33], %45 {strides = array<i32>} : memref<16x32xf32, #tpu.memory_space<vmem>>, vector<16x32xf32>,
    return
  }
  func.func @transform_0(%arg0: i32) -> (i32, i32) {
    %c0_i32 = arith.constant 0 : i32
    %c0_i32_0 = arith.constant 0 : i32
    %c0_i32_1 = arith.constant 0 : i32
    return %c0_i32, %c0_i32_0 : i32, i32
  }
  func.func @transform_1(%arg0: i32) -> (i32, i32) {
    %c0_i32 = arith.constant 0 : i32
    %c0_i32_0 = arith.constant 0 : i32
    %c0_i32_1 = arith.constant 0 : i32
    return %c0_i32, %c0_i32_0 : i32, i32
  }
  func.func @transform_2(%arg0: i32) -> (i32, i32) {
    %c0_i32 = arith.constant 0 : i32
    %c0_i32_0 = arith.constant 0 : i32
    %c0_i32_1 = arith.constant 0 : i32
    return %c0_i32, %c0_i32_0 : i32, i32
  }
  func.func @transform_3(%arg0: i32) -> (i32, i32) {
    %c0_i32 = arith.constant 0 : i32
    %c0_i32_0 = arith.constant 0 : i32
    %c0_i32_1 = arith.constant 0 : i32
    return %c0_i32, %c0_i32_0 : i32, i32
  }
  func.func @transform_4(%arg0: i32) -> (i32, i32) {
    %c0_i32 = arith.constant 0 : i32
    %c0_i32_0 = arith.constant 0 : i32
    %c0_i32_1 = arith.constant 0 : i32
    return %c0_i32, %c0_i32_0 : i32, i32
  }
  func.func @transform_5(%arg0: i32) -> (i32, i32) {
    %c0_i32 = arith.constant 0 : i32
    %c0_i32_0 = arith.constant 0 : i32
    %c0_i32_1 = arith.constant 0 : i32
    return %c0_i32, %c0_i32_0 : i32, i32
  }
  func.func @transform_6(%arg0: i32) -> (i32, i32) {
    %c0_i32 = arith.constant 0 : i32
    %c0_i32_0 = arith.constant 0 : i32
    %c0_i32_1 = arith.constant 0 : i32
    return %c0_i32, %c0_i32_0 : i32, i32
  }
  func.func @transform_7(%arg0: i32) -> (i32, i32) {
    %c0_i32 = arith.constant 0 : i32
    %c0_i32_0 = arith.constant 0 : i32
    %c0_i32_1 = arith.constant 0 : i32
    return %c0_i32, %c0_i32_0 : i32, i32
  }
  func.func @transform_8(%arg0: i32) -> (i32, i32) {
    %c0_i32 = arith.constant 0 : i32
    %c0_i32_0 = arith.constant 0 : i32
    %c0_i32_1 = arith.constant 0 : i32
    return %c0_i32, %c0_i32_0 : i32, i32
  }
  func.func @transform_9(%arg0: i32) -> (i32, i32) {
    %c0_i32 = arith.constant 0 : i32
    %c0_i32_0 = arith.constant 0 : i32
    %c0_i32_1 = arith.constant 0 : i32
    return %c0_i32, %c0_i32_0 : i32, i32
  }
  func.func @transform_10(%arg0: i32) -> (i32, i32) {
    %c0_i32 = arith.constant 0 : i32
    %c0_i32_0 = arith.constant 0 : i32
    %c0_i32_1 = arith.constant 0 : i32
    return %c0_i32, %c0_i32_0 : i32, i32
  }
  func.func @transform_11(%arg0: i32) -> (i32, i32) {
    %c0_i32 = arith.constant 0 : i32
    %c0_i32_0 = arith.constant 0 : i32
    %c0_i32_1 = arith.constant 0 : i32
    return %c0_i32, %c0_i32_0 : i32, i32
  }
  func.func @transform_12(%arg0: i32) -> (i32, i32) {
    %c0_i32 = arith.constant 0 : i32
    %c0_i32_0 = arith.constant 0 : i32
    %c0_i32_1 = arith.constant 0 : i32
    return %c0_i32, %c0_i32_0 : i32, i32
  }
}

</mosaic_0001>

<bundles_post_ra>
// kernel: tpu_custom_call.1
= control target key start
LH: loop header
LB: loop body
LE: loop exit
PB: predicated region body
PF: predicated region fallthrough
CT: control target
= control target key end

     0   :  { %17 = vsyncpa [#allocation3], 0  ;;  %s924_s0 = inlined_call_operand.vmem [shape: f32[16,8], index: 0, kind: input, shape index: {}]   ;;  %s925_s1 = inlined_call_operand.hbm [shape: f32[8,64], index: 1, kind: input, shape index: {}]   ;;  %s926_s2 = inlined_call_operand.vmem [shape: f32[1,64], index: 2, kind: input, shape index: {}]   ;;  %s927_s3 = inlined_call_operand.vmem [shape: f32[1,64], index: 3, kind: input, shape index: {}]   ;;  %s928_s4 = inlined_call_operand.vmem [shape: f32[64,64], index: 4, kind: input, shape index: {}]   ;;  %s929_s5 = inlined_call_operand.vmem [shape: f32[1,64], index: 5, kind: input, shape index: {}]   ;;  %s930_s6 = inlined_call_operand.vmem [shape: f32[1,64], index: 6, kind: input, shape index: {}]   ;;  %s931_s7 = inlined_call_operand.vmem [shape: f32[64,64], index: 7, kind: input, shape index: {}]   ;;  %s932_s8 = inlined_call_operand.vmem [shape: f32[1,64], index: 8, kind: input, shape index: {}]   ;;  %s933_s9 = inlined_call_operand.vmem [shape: f32[1,64], index: 9, kind: input, shape index: {}]   ;;  %s934_s10 = inlined_call_operand.vmem [shape: f32[64,32], index: 10, kind: input, shape index: {}]   ;;  %s935_s11 = inlined_call_operand.vmem [shape: f32[1,32], index: 11, kind: input, shape index: {}]   ;;  %s936_s12 = inlined_call_operand.hbm [shape: f32[16,32], index: 12, kind: output, shape index: {}]  }
   0x1   :  { %18 = vsyncpa [#allocation4], 0  ;;  %s718_s21 = smov [#allocation2]   ;;  %s670_s25 = scalar_lea.hbm %s925_s1, 128 }
   0x2   :  { %s27_s22 = sshll.u32 %s718_s21, 4  ;;  %p671_p0 = scmp.ne.s32.totalorder %s925_s1, %s670_s25  ;;  %s28_s22 = int_to_ptr.vmem [resolvable:$true] %s27_s22 }
   0x3   :  { %p674_p1 = scmp.lt.u32.totalorder %s670_s25, %s925_s1 }
   0x5   :  { %p676_p2 = pnand %p674_p1, %p671_p0 }
   0x7   :  { %679 = shalt.err (!%p676_p2)
}
   0x8   :  { %s680_s30 = scalar_lea.vmem %s28_s22, 128  ;;  %p685_p4 = scmp.lt.s32.totalorder %s28_s22, %s28_s22 }
   0x9   :  { %p681_p3 = scmp.ne.s32.totalorder %s28_s22, %s680_s30  ;;  %p686_p5 = scmp.lt.s32.totalorder %s680_s30, %s680_s30 }
   0xb   :  { %p687_p6 = por %p686_p5, %p685_p4 }
   0xd   :  { %p688_p7 = pnand %p687_p6, %p681_p3 }
   0xf   :  { %691 = shalt.err (!%p688_p7)
}
  0x10   :  { %30 = dma.hbm_to_vmem [thread:$0]  %s925_s1, 128, %s28_s22, [#allocation3]  }
  0x11   :  { %714 = dma.done.wait [#allocation3], 128  }
  0x12   :  { %715 = vsyncadd [#allocation3], 4294967168  ;;  %vm57_vm0 = vcmask 64512   ;;  %v56_v0 = vld [vmem:[#allocation2] sm:$0xff]  ;;  %v54_v1 = vld [vmem:[%s924_s0] sm:$0xff]  ;;  %vm171_vm2 = vcmask 523264  }
  0x13   :  { %v55_v2 = vld [vmem:[%s924_s0 + $0x8] sm:$0xff]  ;;  %556 = vmatprep.subr.mxu0 %v56_v0  ;;  %558 = vmatprep.mubr.msk.f32.mxu0 %vm57_vm0, %v54_v1  ;;  %v163_v3 = vld [vmem:[%s928_s4] sm:$0xff]  ;;  %v165_v5 = vld [vmem:[%s928_s4 + $0x10] sm:$0xff]  ;;  %vm488_vm8 = vcmask 261120  }
  0x14   :  { %v164_v4 = vld [vmem:[%s928_s4 + $0x8] sm:$0xff]  ;;  %557 = vmatpush3.msra.mxu0 %v56_v0  ;;  %v166_v7 = vld [vmem:[%s928_s4 + $0x18] sm:$0xff]  ;;  %v167_v9 = vld [vmem:[%s928_s4 + $0x20] sm:$0xff] }
  0x15   :  { %v618_v6 = vpack.c.bf16 %v164_v4, %v163_v3  ;;  %559 = vmatmul.mubr.msk.f32.vlgmr.msra.gmra.mrb[0].mxu0 %vm57_vm0, %v55_v2  ;;  %v622_v8 = vpack.c.bf16 %v166_v7, %v165_v5  ;;  %v168_v10 = vld [vmem:[%s928_s4 + $0x28] sm:$0xff]  ;;  %v169_v12 = vld [vmem:[%s928_s4 + $0x30] sm:$0xff]  ;;  %v170_v13 = vld [vmem:[%s928_s4 + $0x38] sm:$0xff] }
  0x16   :  { %v626_v11 = vpack.c.bf16 %v168_v10, %v167_v9  ;;  %v630_v14 = vpack.c.bf16 %v170_v13, %v169_v12  ;;  %v277_v15 = vld [vmem:[%s931_s7] sm:$0xff]  ;;  %v278_v16 = vld [vmem:[%s931_s7 + $0x8] sm:$0xff]  ;;  %v279_v17 = vld [vmem:[%s931_s7 + $0x10] sm:$0xff] }
  0x17   :  { %619 = vmatprep.subr.bf16.mxu1 %v618_v6  ;;  %v634_v18 = vpack.c.bf16 %v278_v16, %v277_v15  ;;  %v280_v19 = vld [vmem:[%s931_s7 + $0x18] sm:$0xff]  ;;  %v510_v21 = vld [vmem:[%s926_s2] ss:$0 sm:$0xff]  ;;  %v282_v34 = vld [vmem:[%s931_s7 + $0x28] sm:$0xff] }
  0x18   :  { %621 = vmatpush3.bf16.msra.mxu1 %v618_v6  ;;  %v638_v20 = vpack.c.bf16 %v280_v19, %v279_v17  ;;  %v511_v23 = vld [vmem:[%s927_s3] ss:$0 sm:$0xff]  ;;  %v283_v36 = vld [vmem:[%s931_s7 + $0x30] sm:$0xff]  ;;  %v284_v37 = vld [vmem:[%s931_s7 + $0x38] sm:$0xff] }
  0x19   :  { %623 = vmatprep.subr.bf16.mxu1 %v622_v8  ;;  %635 = vmatprep.subr.bf16.mxu0 %v634_v18  ;;  %v281_v33 = vld [vmem:[%s931_s7 + $0x20] sm:$0xff]  ;;  %v646_v38 = vpack.c.bf16 %v284_v37, %v283_v36  ;;  %v393_v40 = vld [vmem:[%s934_s10 + $0x8] sm:$0xff]  ;;  %v394_v54 = vld [vmem:[%s934_s10 + $0x10] sm:$0xff] }
  0x1a   :  { %637 = vmatpush3.bf16.msra.mxu0 %v634_v18  ;;  %v642_v35 = vpack.c.bf16 %v282_v34, %v281_v33  ;;  %v392_v39 = vld [vmem:[%s934_s10] sm:$0xff]  ;;  %v395_v55 = vld [vmem:[%s934_s10 + $0x18] sm:$0xff]  ;;  %v397_v58 = vld [vmem:[%s934_s10 + $0x28] sm:$0xff] }
  0x1b   :  { %639 = vmatprep.subr.bf16.mxu0 %v638_v20  ;;  %v650_v41 = vpack.c.bf16 %v393_v40, %v392_v39  ;;  %v514_v42 = vld [vmem:[%s929_s5] ss:$0 sm:$0xff]  ;;  %v654_v56 = vpack.c.bf16 %v395_v55, %v394_v54  ;;  %v398_v60 = vld [vmem:[%s934_s10 + $0x30] sm:$0xff]  ;;  %v399_v61 = vld [vmem:[%s934_s10 + $0x38] sm:$0xff] }
  0x1c   :  { %625 = vmatpush3.bf16.msra.mxu1 %v622_v8  ;;  %v515_v44 = vld [vmem:[%s930_s6] ss:$0 sm:$0xff]  ;;  %v662_v62 = vpack.c.bf16 %v399_v61, %v398_v60 }
  0x1d   :  { %627 = vmatprep.subr.bf16.mxu1 %v626_v11  ;;  %v396_v57 = vld [vmem:[%s934_s10 + $0x20] sm:$0xff]  ;;  %s719_s10 = smov [#allocation5]  }
  0x1e   :  { %641 = vmatpush3.bf16.msra.mxu0 %v638_v20  ;;  %v658_v59 = vpack.c.bf16 %v397_v58, %v396_v57  ;;  %v518_v63 = vld [vmem:[%s932_s8] ss:$0 sm:$0xff]  ;;  %s496_s28 = sshll.u32 %s719_s10, 4  ;;  %s497_s28 = int_to_ptr.vmem [resolvable:$true] %s496_s28 }
  0x1f   :  { %643 = vmatprep.subr.bf16.mxu0 %v642_v35  ;;  %v519_v1 = vld [vmem:[%s933_s9] ss:$0 sm:$0xff]  ;;  %s692_s29 = scalar_lea.vmem %s497_s28, 256  ;;  %p697_p9 = scmp.lt.s32.totalorder %s497_s28, %s497_s28 }
  0x20   :  { %629 = vmatpush3.bf16.msra.mxu1 %v626_v11  ;;  %v520_v13 = vld [vmem:[%s935_s11] ss:$0 sm:$0xff]  ;;  %p693_p8 = scmp.ne.s32.totalorder %s497_s28, %s692_s29  ;;  %p698_p10 = scmp.lt.s32.totalorder %s692_s29, %s692_s29 }
  0x21   :  { %631 = vmatprep.subr.bf16.mxu1 %v630_v14 }
  0x22   :  { %645 = vmatpush3.bf16.msra.mxu0 %v642_v35  ;;  %p699_p11 = por %p698_p10, %p697_p9 }
  0x23   :  { %647 = vmatprep.subr.bf16.mxu0 %v646_v38 }
  0x24   :  { %633 = vmatpush3.bf16.msra.mxu1 %v630_v14  ;;  %p700_p12 = pnand %p699_p11, %p693_p8 }
  0x25   :  { %651 = vmatprep.subr.bf16.mxu1 %v650_v41 }
  0x26   :  { %649 = vmatpush3.bf16.msra.mxu0 %v646_v38 }
  0xe8   :  { %v560_v22 = vpop.f32.mrb[0].mxu0 }
  0xe9   :  { %v147_v24 = vmul.f32 %v560_v22, %v510_v21  ;;  %v130_v25 = vpop.f32.mrb[1].mxu0 }
  0xea   :  { %v146_v26 = vmul.f32 %v510_v21, %v130_v25 }
  0xeb   :  { %v156_v27 = vadd.f32 %v511_v23, %v147_v24 }
  0xec   :  { %v155_v28 = vadd.f32 %v511_v23, %v146_v26 }
  0xed   :  { %v160_v29 = vmul.f32 0.2, %v156_v27  ;;  %vm158_vm3 = vcmp.ge.f32.partialorder %v156_v27, 0.0 }
  0xee   :  { %vm157_vm1 = vcmp.ge.f32.partialorder %v155_v28, 0.0  ;;  %v159_v30 = vmul.f32 0.2, %v155_v28 }
  0xef   :  { %v851_v32 = vsel %vm158_vm3, %v156_v27, %v160_v29 }
  0xf0   :  { %v847_v31 = vsel %vm157_vm1, %v155_v28, %v159_v30 }
  0xf1   :  { %577 = vmatprep.mubr.msk.f32.mxu1 %vm171_vm2, %v847_v31 }
  0xf2   :  { %578 = vmatmul.mubr.msk.f32.vlgmr.msra.gmra.mrb[0].mxu1 %vm171_vm2, %v851_v32 }
  0xf3   :  { %653 = vmatpush3.bf16.msra.mxu1 %v650_v41 }
  0xf4   :  { %655 = vmatprep.subr.bf16.mxu1 %v654_v56 }
  0xf7   :  { %657 = vmatpush3.bf16.msra.mxu1 %v654_v56 }
  0xf8   :  { %659 = vmatprep.subr.bf16.mxu1 %v658_v59 }
  0xfb   :  { %661 = vmatpush3.bf16.msra.mxu1 %v658_v59 }
  0xfc   :  { %663 = vmatprep.subr.bf16.mxu1 %v662_v62 }
  0xff   :  { %665 = vmatpush3.bf16.msra.mxu1 %v662_v62 }
 0x1c5   :  { %v579_v43 = vpop.f32.mrb[0].mxu1 }
 0x1c6   :  { %v261_v45 = vmul.f32 %v579_v43, %v514_v42  ;;  %v244_v46 = vpop.f32.mrb[1].mxu1 }
 0x1c7   :  { %v260_v47 = vmul.f32 %v514_v42, %v244_v46 }
 0x1c8   :  { %v270_v48 = vadd.f32 %v515_v44, %v261_v45 }
 0x1c9   :  { %v269_v49 = vadd.f32 %v515_v44, %v260_v47 }
 0x1ca   :  { %v274_v50 = vmul.f32 0.2, %v270_v48  ;;  %vm272_vm4 = vcmp.ge.f32.partialorder %v270_v48, 0.0 }
 0x1cb   :  { %v273_v51 = vmul.f32 0.2, %v269_v49  ;;  %vm271_vm5 = vcmp.ge.f32.partialorder %v269_v49, 0.0 }
 0x1cc   :  { %v276_v53 = vsel %vm272_vm4, %v270_v48, %v274_v50 }
 0x1cd   :  { %v275_v52 = vsel %vm271_vm5, %v269_v49, %v273_v51 }
 0x1ce   :  { %596 = vmatprep.mubr.msk.f32.mxu0 %vm171_vm2, %v275_v52 }
 0x1cf   :  { %597 = vmatmul.mubr.msk.f32.vlgmr.msra.gmra.mrb[2].mxu0 %vm171_vm2, %v276_v53 }
 0x2a2   :  { %v598_v0 = vpop.f32.mrb[2].mxu0 }
 0x2a3   :  { %v374_v2 = vmul.f32 %v598_v0, %v518_v63  ;;  %v357_v3 = vpop.f32.mrb[3].mxu0 }
 0x2a4   :  { %v373_v4 = vmul.f32 %v518_v63, %v357_v3 }
 0x2a5   :  { %v383_v5 = vadd.f32 %v519_v1, %v374_v2 }
 0x2a6   :  { %v382_v6 = vadd.f32 %v519_v1, %v373_v4 }
 0x2a7   :  { %vm385_vm6 = vcmp.ge.f32.partialorder %v383_v5, 0.0  ;;  %v387_v7 = vmul.f32 0.2, %v383_v5 }
 0x2a8   :  { %vm384_vm7 = vcmp.ge.f32.partialorder %v382_v6, 0.0  ;;  %v386_v8 = vmul.f32 0.2, %v382_v6 }
 0x2a9   :  { %v389_v9 = vsel %vm385_vm6, %v383_v5, %v387_v7 }
 0x2aa   :  { %v388_v10 = vsel %vm384_vm7, %v382_v6, %v386_v8  ;;  %v391_v12 = vadd.f32 %v389_v9, %v851_v32 }
 0x2ab   :  { %v390_v11 = vadd.f32 %v388_v10, %v847_v31 }
 0x2ad   :  { %615 = vmatprep.mubr.msk.f32.mxu1 %vm171_vm2, %v390_v11 }
 0x2ae   :  { %616 = vmatmul.mubr.msk.f32.vlgmr.msra.gmra.mrb[2].mxu1 %vm171_vm2, %v391_v12 }
 0x381   :  { %v617_v14 = vpop.f32.mrb[2].mxu1 }
 0x382   :  { %v485_v15 = vadd.f32 %v617_v14, %v520_v13  ;;  %v479_v16 = vpop.f32.mrb[3].mxu1 }
 0x383   :  { %v480_v17 = vadd.f32 %v520_v13, %v479_v16 }
 0x384   :  { %490 = vst.msk [vmem:[#allocation5 + $0x8] sm:$0xff] %vm488_vm8, %v485_v15 }
 0x385   :  { %489 = vst.msk [vmem:[#allocation5] sm:$0xff] %vm488_vm8, %v480_v17 }
 0x386   :  { %703 = shalt.err (!%p700_p12)
}
 0x387   :  { %s704_s11 = scalar_lea.hbm %s936_s12, 256 }
 0x388   :  { %p705_p13 = scmp.ne.s32.totalorder %s936_s12, %s704_s11  ;;  %p708_p0 = scmp.lt.u32.totalorder %s704_s11, %s936_s12 }
 0x38a   :  { %p710_p1 = pnand %p708_p0, %p705_p13 }
 0x38c   :  { %713 = shalt.err (!%p710_p1)
}
 0x38d   :  { %s720_s7 = smov 128   ;;  %s721_s18 = smov 8  }
 0x38e   :  { %502 = dma.vmem_to_hbm [thread:$0]  %s497_s28, 256, %s936_s12, [#allocation4], %s720_s7, %s720_s7, %s721_s18  }
 0x38f   :  { %716 = dma.done.wait [#allocation4], 256  }
 0x390   :  { %717 = vsyncadd [#allocation4], 4294967040 }
 0x391   :  { %506 = vsyncpa [#allocation3], 1 }
 0x392   :  { %507 = vsyncpa [#allocation4], 1 }

</bundles_post_ra>
